<compile_context>
chip_gen: v6e
topology: v6e:2x2x1
jax: 0.10.0
libtpu: 0.0.40
codegen_flags: <defaults>
</compile_context>

<pallas_src>
import functools
import math

import jax
import jax.numpy as jnp
import numpy as np
from jax import lax
from jax.experimental import pallas as pl
from jax.experimental.pallas import tpu as pltpu

LOG2 = math.log(2.0)


def _softplus_neg(x):
    # Numerically stable softplus(-x) = max(-x, 0) + log1p(exp(-|x|))
    return jnp.maximum(-x, 0.0) + jnp.log1p(jnp.exp(-jnp.abs(x)))


def _round_up(x, m):
    return ((x + m - 1) // m) * m


def mi_loss_kernel(seg_ref, l_ref, g_ref, ep_ref, eq_ref, *,
                   num_graphs, softplus_dtype):
    """One N-tile: MXU matmul vs all sentence embeddings + JSD partial sums.

    seg_ref: (tile_n, 1) int32  segment id per token (-1 for padded rows)
    l_ref  : (tile_n, D_pad)    local (token) reps        (bf16 or f32)
    g_ref  : (B_pad, D_pad)     global (sentence) reps    (resident across grid)
    ep_ref : (8, B_pad) f32     per-tile positive partial sums
    eq_ref : (8, B_pad) f32     per-tile negative partial sums
    """
    # (tile_n, D_pad) x (B_pad, D_pad) contracting dim 1 of both -> (tile_n, B_pad)
    # bf16 x bf16 -> f32 accumulation on the MXU by default.
    res = lax.dot_general(
        l_ref[...], g_ref[...],
        dimension_numbers=(((1,), (1,)), ((), ())),
        preferred_element_type=jnp.float32,
    )
    tn, bp = res.shape

    # Rebuild the complementary 0/1 masks in-kernel (no mask HBM traffic).
    seg = seg_ref[...]                                        # (tn, 1) int32
    cols = lax.broadcasted_iota(jnp.int32, (tn, bp), 1)       # (tn, bp)
    pos = (seg == cols).astype(jnp.float32)                   # (tn, bp)
    valid_row = (seg >= 0).astype(jnp.float32)                # (tn, 1)
    valid_col = (cols < num_graphs).astype(jnp.float32)       # (tn, bp)
    neg = valid_row * valid_col * (1.0 - pos)

    # softplus(-res) computed once per element (masked positions contribute 0
    # either way).  Optional bf16 EUP path for v6e/v7x; accumulation stays f32.
    if jnp.dtype(softplus_dtype) == jnp.dtype(jnp.float32):
        sp = _softplus_neg(res)
    else:
        sp = _softplus_neg(res.astype(softplus_dtype)).astype(jnp.float32)

    ep_t = (jnp.float32(LOG2) - sp) * pos                     # positive part
    eq_t = (sp + res - jnp.float32(LOG2)) * neg               # negative part

    # Fold the tile down to one (8, B_pad) vreg slab with pure VPU adds
    # (tn is always a multiple of 8; the reshape is tiling-native).
    ep_ref[...] = ep_t.reshape(tn // 8, 8, bp).sum(axis=0)
    eq_ref[...] = eq_t.reshape(tn // 8, 8, bp).sum(axis=0)


def mutual_information_loss(local_rep, global_rep, seg_ids, *,
                            tile_n=512,
                            matmul_dtype=jnp.bfloat16,
                            softplus_dtype=jnp.float32):
    """local_rep: (N, D), global_rep: (B, D), seg_ids: (N,) int32 -> scalar loss."""
    N, D = local_rep.shape
    B, D2 = global_rep.shape
    assert D == D2

    # Lane-dense padding of the hidden and batch dims; row-tile sized for VMEM.
    D_pad = _round_up(D, 128)
    B_pad = _round_up(B, 128)
    itemsize = jnp.dtype(matmul_dtype).itemsize

    # Resident global block: single-buffer it when it is big (constant
    # index_map, never re-fetched) so it doesn't eat half of v7x's VMEM.
    if 2 * B_pad * D_pad * itemsize > (8 << 20):
        g_spec = pl.BlockSpec((B_pad, D_pad), lambda i: (0, 0),
                              pipeline_mode=pl.Buffered(1))
        g_buffers = 1
    else:
        g_spec = pl.BlockSpec((B_pad, D_pad), lambda i: (0, 0))
        g_buffers = 2

    tile_n = max(8, min(_round_up(tile_n, 8), _round_up(N, 8)))

    def _vmem_budget(tn):
        return (2 * tn * D_pad * itemsize            # local tile, double-buffered
                + g_buffers * B_pad * D_pad * itemsize  # resident global_rep
                + 2 * tn * 128 * 4                   # seg column, lane-padded, x2
                + 2 * 2 * 8 * B_pad * 4              # two (8,B_pad) f32 outs, x2
                + 8 * tn * B_pad * 4                 # in-kernel f32 temporaries
                + (2 << 20))                         # compiler slack

    # Keep the budget comfortably under v7x's 64 MiB/TC physical VMEM.
    while tile_n > 256 and _vmem_budget(tile_n) > (40 << 20):
        tile_n = max(8, _round_up(tile_n // 2, 8))
    vmem_limit = max(16 << 20, int(_vmem_budget(tile_n)))

    N_pad = _round_up(N, tile_n)
    num_tiles = N_pad // tile_n

    # Cast once; pad (zeros) only if needed — no full zeros().at[].set() copy.
    l = local_rep.astype(matmul_dtype)
    if (N_pad, D_pad) != (N, D):
        l = jnp.pad(l, ((0, N_pad - N), (0, D_pad - D)))
    g = global_rep.astype(matmul_dtype)
    if (B_pad, D_pad) != (B, D):
        g = jnp.pad(g, ((0, B_pad - B), (0, D_pad - D)))
    seg = jnp.full((N_pad, 1), -1, jnp.int32).at[:N, 0].set(
        seg_ids.astype(jnp.int32))

    cost = pl.CostEstimate(
        flops=2 * N_pad * D_pad * B_pad,
        transcendentals=2 * N_pad * B_pad,
        bytes_accessed=(N_pad * D_pad * itemsize + B_pad * D_pad * itemsize
                        + 4 * N_pad + 4 * 2 * num_tiles * 8 * B_pad),
    )

    kernel = functools.partial(mi_loss_kernel, num_graphs=B,
                               softplus_dtype=softplus_dtype)

    ep_part, eq_part = pl.pallas_call(
        kernel,
        out_shape=(
            jax.ShapeDtypeStruct((num_tiles, 8, B_pad), jnp.float32),
            jax.ShapeDtypeStruct((num_tiles, 8, B_pad), jnp.float32),
        ),
        grid_spec=pltpu.PrefetchScalarGridSpec(
            num_scalar_prefetch=0,
            grid=(num_tiles,),
            in_specs=[
                pl.BlockSpec((tile_n, 1), lambda i: (i, 0)),       # seg ids tile
                pl.BlockSpec((tile_n, D_pad), lambda i: (i, 0)),   # local_rep tile
                g_spec,                                            # global_rep (resident)
            ],
            out_specs=[
                pl.BlockSpec((None, 8, B_pad), lambda i: (i, 0, 0)),
                pl.BlockSpec((None, 8, B_pad), lambda i: (i, 0, 0)),
            ],
        ),
        compiler_params=pltpu.CompilerParams(
            dimension_semantics=("parallel",),       # independent N-tiles
            vmem_limit_bytes=vmem_limit,
        ),
        cost_estimate=cost,
    )(seg, l, g)

    # Final (tiny) reductions + exact unpadded denominators in the wrapper.
    e_pos = jnp.sum(ep_part) / N
    e_neg = jnp.sum(eq_part) / (N * (B - 1))
    return e_neg - e_pos


def create_masks(lengths, batch):
    """JAX equivalent of MutualInformationLoss.create_masks (static lengths)."""
    seg_ids = jnp.asarray(np.repeat(np.arange(batch), lengths), dtype=jnp.int32)
    pos_mask = (seg_ids[:, None] == jnp.arange(batch)[None, :]).astype(jnp.float32)
    neg_mask = 1.0 - pos_mask
    return pos_mask, neg_mask


def reference_loss(local_rep, global_rep, pos_mask, neg_mask):
    """Pure-JAX reference mirroring local_global_loss_ with measure='JSD'."""
    res = local_rep @ global_rep.T
    N, B = pos_mask.shape
    p = res * pos_mask
    q = res * neg_mask
    ep = LOG2 - _softplus_neg(p)
    eq = _softplus_neg(q) + q - LOG2
    return jnp.sum(eq) / (N * (B - 1)) - jnp.sum(ep) / N


if __name__ == "__main__":
    key = jax.random.PRNGKey(0)
    k1, k2 = jax.random.split(key)

    batch = 4
    hidden = 32
    lengths = [5, 7, 6, 6]           # sentence_lengths (clamped >= 1); sum = 24
    n_tokens = int(np.sum(lengths))  # N = 24

    # local_rep = concatenated (unpadded) token embeddings,
    # global_rep = sentence embeddings.
    local_rep = jax.random.normal(k1, (n_tokens, hidden), dtype=jnp.float32)
    global_rep = jax.random.normal(k2, (batch, hidden), dtype=jnp.float32)
    seg_ids = jnp.asarray(np.repeat(np.arange(batch), lengths), dtype=jnp.int32)

    pos_mask, neg_mask = create_masks(lengths, batch)
    ref = jax.block_until_ready(
        reference_loss(local_rep, global_rep, pos_mask, neg_mask))

    # Exact-numerics path (f32 MXU) — matches the PyTorch module bit-for-bit.
    loss_f32 = jax.block_until_ready(
        mutual_information_loss(local_rep, global_rep, seg_ids,
                                matmul_dtype=jnp.float32))
    np.testing.assert_allclose(np.asarray(loss_f32), np.asarray(ref),
                               rtol=1e-5, atol=1e-5)

    # Default fast path (bf16 MXU inputs, f32 accumulation).
    loss_bf16 = jax.block_until_ready(
        mutual_information_loss(local_rep, global_rep, seg_ids))
    np.testing.assert_allclose(np.asarray(loss_bf16), np.asarray(ref),
                               rtol=5e-2, atol=5e-2)

    print("KERNEL_OK")
</pallas_src>

<mosaic_0001>
module attributes {stable_mosaic.version = 11 : i64} {
  func.func @mi_loss_kernel(%arg0: i32, %arg1: memref<24x1xi32, #tpu.memory_space<vmem>>, %arg2: memref<24x128xf32, #tpu.memory_space<vmem>>, %arg3: memref<128x128xf32, #tpu.memory_space<vmem>>, %arg4: memref<1x8x128xf32, #tpu.memory_space<vmem>>, %arg5: memref<1x8x128xf32, #tpu.memory_space<vmem>>) attributes {dimension_semantics = [#tpu.dimension_semantics<parallel>], iteration_bounds = array<i64: 1>, scalar_prefetch = 0 : i64, scratch_operands = 0 : i64, tpu.core_type = #tpu.core_type<tc>, window_params = [{transform_indices = @transform_0, window_bounds = array<i64: 24, 1>}, {transform_indices = @transform_1, window_bounds = array<i64: 24, 128>}, {pipeline_mode = #tpu.pipeline_mode<synchronous>, transform_indices = @transform_2, window_bounds = array<i64: 128, 128>}, {transform_indices = @transform_3, window_bounds = array<i64: 1, 8, 128>}, {transform_indices = @transform_4, window_bounds = array<i64: 1, 8, 128>}]} {
    %c0 = arith.constant 0 : index
    %c0_0 = arith.constant 0 : index
    %0 = vector.load %arg2[%c0, %c0_0] : memref<24x128xf32, #tpu.memory_space<vmem>>, vector<24x128xf32>
    %c0_1 = arith.constant 0 : index
    %c0_2 = arith.constant 0 : index
    %1 = vector.load %arg3[%c0_1, %c0_2] : memref<128x128xf32, #tpu.memory_space<vmem>>, vector<128x128xf32>
    %cst = arith.constant dense<0.000000e+00> : vector<24x128xf32>
    %2 = tpu.matmul %0, %1, %cst {dimension_numbers = #tpu.dot_dimension_numbers<[1], [1], [0], [0], [0, 0, 1, 0], [], []>} : vector<24x128xf32>, vector<128x128xf32>, vector<24x128xf32> -> vector<24x128xf32>
    %c0_3 = arith.constant 0 : index
    %c0_4 = arith.constant 0 : index
    %3 = vector.load %arg1[%c0_3, %c0_4] : memref<24x1xi32, #tpu.memory_space<vmem>>, vector<24x1xi32>
    %4 = tpu.iota {dimensions = array<i32: 1>} : vector<24x128xi32>
    %5 = vector.broadcast %3 : vector<24x1xi32> to vector<24x128xi32>
    %6 = arith.cmpi eq, %5, %4 : vector<24x128xi32>
    %7 = arith.extui %6 : vector<24x128xi1> to vector<24x128xi32>
    %8 = arith.sitofp %7 : vector<24x128xi32> to vector<24x128xf32>
    %c0_i32 = arith.constant 0 : i32
    %9 = vector.broadcast %c0_i32 : i32 to vector<24x1xi32>
    %10 = arith.cmpi sge, %3, %9 : vector<24x1xi32>
    %11 = arith.extui %10 : vector<24x1xi1> to vector<24x1xi32>
    %12 = arith.sitofp %11 : vector<24x1xi32> to vector<24x1xf32>
    %c4_i32 = arith.constant 4 : i32
    %13 = vector.broadcast %c4_i32 : i32 to vector<24x128xi32>
    %14 = arith.cmpi slt, %4, %13 : vector<24x128xi32>
    %15 = arith.extui %14 : vector<24x128xi1> to vector<24x128xi32>
    %16 = arith.sitofp %15 : vector<24x128xi32> to vector<24x128xf32>
    %17 = vector.broadcast %12 : vector<24x1xf32> to vector<24x128xf32>
    %18 = arith.mulf %17, %16 : vector<24x128xf32>
    %cst_5 = arith.constant 1.000000e+00 : f32
    %19 = vector.broadcast %cst_5 : f32 to vector<24x128xf32>
    %20 = arith.subf %19, %8 : vector<24x128xf32>
    %21 = arith.mulf %18, %20 : vector<24x128xf32>
    %cst_6 = arith.constant 0.000000e+00 : f32
    %22 = vector.broadcast %cst_6 : f32 to vector<24x128xf32>
    %23 = arith.subf %22, %2 : vector<24x128xf32>
    %cst_7 = arith.constant 0.000000e+00 : f32
    %24 = vector.broadcast %cst_7 : f32 to vector<24x128xf32>
    %25 = arith.maximumf %23, %24 : vector<24x128xf32>
    %26 = math.absf %2 : vector<24x128xf32>
    %cst_8 = arith.constant 0.000000e+00 : f32
    %27 = vector.broadcast %cst_8 : f32 to vector<24x128xf32>
    %28 = arith.subf %27, %26 : vector<24x128xf32>
    %29 = math.exp %28 : vector<24x128xf32>
    %30 = math.log1p %29 : vector<24x128xf32>
    %31 = arith.addf %25, %30 : vector<24x128xf32>
    %cst_9 = arith.constant 0.693147182 : f32
    %32 = vector.broadcast %cst_9 : f32 to vector<24x128xf32>
    %33 = arith.subf %32, %31 : vector<24x128xf32>
    %34 = arith.mulf %33, %8 : vector<24x128xf32>
    %35 = arith.addf %31, %2 : vector<24x128xf32>
    %cst_10 = arith.constant 0.693147182 : f32
    %36 = vector.broadcast %cst_10 : f32 to vector<24x128xf32>
    %37 = arith.subf %35, %36 : vector<24x128xf32>
    %38 = arith.mulf %37, %21 : vector<24x128xf32>
    %39 = vector.shape_cast %34 : vector<24x128xf32> to vector<3x8x128xf32>
    %cst_11 = arith.constant dense<0.000000e+00> : vector<8x128xf32>
    %40 = vector.multi_reduction <add>, %39, %cst_11 [0] : vector<3x8x128xf32> to vector<8x128xf32>
    %c0_12 = arith.constant 0 : index
    %c0_13 = arith.constant 0 : index
    %c0_14 = arith.constant 0 : index
    %41 = vector.load %arg4[%c0_12, %c0_13, %c0_14] : memref<1x8x128xf32, #tpu.memory_space<vmem>>, vector<1x8x128xf32>
    %42 = vector.shape_cast %41 : vector<1x8x128xf32> to vector<8x128xf32>
    %43 = vector.shape_cast %40 : vector<8x128xf32> to vector<1x8x128xf32>
    tpu.vector_store %arg4[%c0_12, %c0_13, %c0_14], %43 {strides = array<i32>} : memref<1x8x128xf32, #tpu.memory_space<vmem>>, vector<1x8x128xf32>,
    %44 = vector.shape_cast %38 : vector<24x128xf32> to vector<3x8x128xf32>
    %cst_15 = arith.constant dense<0.000000e+00> : vector<8x128xf32>
    %45 = vector.multi_reduction <add>, %44, %cst_15 [0] : vector<3x8x128xf32> to vector<8x128xf32>
    %c0_16 = arith.constant 0 : index
    %c0_17 = arith.constant 0 : index
    %c0_18 = arith.constant 0 : index
    %46 = vector.load %arg5[%c0_16, %c0_17, %c0_18] : memref<1x8x128xf32, #tpu.memory_space<vmem>>, vector<1x8x128xf32>
    %47 = vector.shape_cast %46 : vector<1x8x128xf32> to vector<8x128xf32>
    %48 = vector.shape_cast %45 : vector<8x128xf32> to vector<1x8x128xf32>
    tpu.vector_store %arg5[%c0_16, %c0_17, %c0_18], %48 {strides = array<i32>} : memref<1x8x128xf32, #tpu.memory_space<vmem>>, vector<1x8x128xf32>,
    return
  }
  func.func @transform_0(%arg0: i32) -> (i32, i32) {
    %c0_i32 = arith.constant 0 : i32
    %c0_i32_0 = arith.constant 0 : i32
    return %arg0, %c0_i32 : i32, i32
  }
  func.func @transform_1(%arg0: i32) -> (i32, i32) {
    %c0_i32 = arith.constant 0 : i32
    %c0_i32_0 = arith.constant 0 : i32
    return %arg0, %c0_i32 : i32, i32
  }
  func.func @transform_2(%arg0: i32) -> (i32, i32) {
    %c0_i32 = arith.constant 0 : i32
    %c0_i32_0 = arith.constant 0 : i32
    %c0_i32_1 = arith.constant 0 : i32
    return %c0_i32, %c0_i32_0 : i32, i32
  }
  func.func @transform_3(%arg0: i32) -> (i32, i32, i32) {
    %c0_i32 = arith.constant 0 : i32
    %c0_i32_0 = arith.constant 0 : i32
    %c0_i32_1 = arith.constant 0 : i32
    return %arg0, %c0_i32, %c0_i32_0 : i32, i32, i32
  }
  func.func @transform_4(%arg0: i32) -> (i32, i32, i32) {
    %c0_i32 = arith.constant 0 : i32
    %c0_i32_0 = arith.constant 0 : i32
    %c0_i32_1 = arith.constant 0 : i32
    return %arg0, %c0_i32, %c0_i32_0 : i32, i32, i32
  }
}

</mosaic_0001>

<bundles_post_ra>
// kernel: tpu_custom_call.1
= control target key start
LH: loop header
LB: loop body
LE: loop exit
PB: predicated region body
PF: predicated region fallthrough
CT: control target
= control target key end

     0   :  { %10 = vsyncpa [#allocation3], 0  ;;  %s603_s0 = inlined_call_operand.vmem [shape: s32[24,1], index: 0, kind: input, shape index: {}]   ;;  %s604_s1 = inlined_call_operand.vmem [shape: f32[24,128], index: 1, kind: input, shape index: {}]   ;;  %s605_s2 = inlined_call_operand.hbm [shape: f32[128,128], index: 2, kind: input, shape index: {}]   ;;  %s606_s3 = inlined_call_operand.hbm [shape: f32[1,8,128], index: 3, kind: output, shape index: {0}]   ;;  %s607_s4 = inlined_call_operand.hbm [shape: f32[1,8,128], index: 4, kind: output, shape index: {1}]  }
   0x1   :  { %11 = vsyncpa [#allocation4], 0 }
   0x2   :  { %12 = vsyncpa [#allocation7], 0  ;;  %s483_s15 = smov [#allocation2]  }
   0x3   :  { %s22_s16 = sshll.u32 %s483_s15, 4  ;;  %s23_s16 = int_to_ptr.vmem [resolvable:$true] %s22_s16 }
   0x4   :  { %s425_s17 = scalar_lea.vmem %s23_s16, 2048  ;;  %p430_p1 = scmp.lt.s32.totalorder %s23_s16, %s23_s16 }
   0x5   :  { %p426_p0 = scmp.ne.s32.totalorder %s23_s16, %s425_s17  ;;  %p431_p2 = scmp.lt.s32.totalorder %s425_s17, %s425_s17 }
   0x7   :  { %p432_p3 = por %p431_p2, %p430_p1 }
   0x9   :  { %p433_p4 = pnand %p432_p3, %p426_p0 }
   0xb   :  { %436 = shalt.err (!%p433_p4)
}
   0xc   :  { %s484_s18 = smov 128   ;;  %s485_s19 = smov 8  }
   0xd   :  { %28 = dma.hbm_to_vmem [thread:$0]  %s605_s2, 2048, %s23_s16, [#allocation3], %s484_s18, %s484_s18, %s485_s19  }
   0xe   :  { %477 = dma.done.wait [#allocation3], 2048  }
   0xf   :  { %478 = vsyncadd [#allocation3], 4294965248  ;;  %v486_v0 = vmov 0.0   ;;  %vm487_vm0 = vmmov 0   ;;  %v488_v1 = vmov 0   ;;  %v50_v2 = vld [vmem:[#allocation2 + $0x78] sm:$0xff]  ;;  %v134_v47 = vlaneseq }
  0x10   :  { %317 = vmatprep.subr.mxu0 %v486_v0  ;;  %358 = vmatprep.subr.mxu1 %v486_v0  ;;  %v49_v3 = vld [vmem:[#allocation2 + $0x70] sm:$0xff]  ;;  %v48_v4 = vld [vmem:[#allocation2 + $0x68] sm:$0xff]  ;;  %v131_v5 = vld [vmem:[%s603_s0] sm:$0xff]  ;;  %s490_s7 = smov [#allocation6]  }
  0x11   :  { %349 = vmatprep.mubr.msk.f32.mxu0 %vm487_vm0, %v486_v0  ;;  %352 = vmatprep.mubr.msk.f32.mxu1 %vm487_vm0, %v486_v0  ;;  %v133_v6 = vld [vmem:[%s603_s0 + $0x10] sm:$0xff]  ;;  %vm154_vm1 = vcmp.ge.s32.totalorder %v131_v5, 0  ;;  %v132_v7 = vld [vmem:[%s603_s0 + $0x8] sm:$0xff]  ;;  %v47_v10 = vld [vmem:[#allocation2 + $0x60] sm:$0xff]  ;;  %v135_v51 = vand.u32 127, %v134_v47  ;;  %s275_s8 = sshll.u32 %s490_s7, 4  ;;  %s276_s8 = int_to_ptr.vmem [resolvable:$true] %s275_s8 }
  0x12   :  { %398 = vset.pattern.permute.xlu0 %v488_v1  ;;  %399 = vset.pattern.permute.xlu1 %v488_v1  ;;  %v291_v8 = vsel %vm154_vm1, 1.0, %v486_v0  ;;  %vm155_vm2 = vcmp.ge.s32.totalorder %v132_v7, 0  ;;  %vm156_vm3 = vcmp.ge.s32.totalorder %v133_v6, 0  ;;  %v46_v13 = vld [vmem:[#allocation2 + $0x58] sm:$0xff]  ;;  %v45_v14 = vld [vmem:[#allocation2 + $0x50] sm:$0xff]  ;;  %v44_v15 = vld [vmem:[#allocation2 + $0x48] sm:$0xff] }
  0x13   :  { %318 = vmatpush3.xpose.msra.mxu0 %v50_v2  ;;  %374 = vmatpush3.xpose.msra.mxu1 %v50_v2  ;;  %v292_v9 = vsel %vm155_vm2, 1.0, %v486_v0  ;;  %v293_v12 = vsel %vm156_vm3, 1.0, %v486_v0  ;;  %v43_v16 = vld [vmem:[#allocation2 + $0x40] sm:$0xff]  ;;  %v42_v17 = vld [vmem:[#allocation2 + $0x38] sm:$0xff]  ;;  %v41_v18 = vld [vmem:[#allocation2 + $0x30] sm:$0xff]  ;;  %vm163_vm7 = vcmp.lt.s32.totalorder %v135_v51, 4 }
  0x14   :  { %319 = vmatprep.subr.mxu0 %v486_v0  ;;  %359 = vmatprep.subr.mxu1 %v486_v0  ;;  %v400_v11 = vpack.i.bf16 %v292_v9, %v291_v8  ;;  %v40_v19 = vld [vmem:[#allocation2 + $0x28] sm:$0xff]  ;;  %v39_v20 = vld [vmem:[#allocation2 + $0x20] sm:$0xff]  ;;  %v38_v21 = vld [vmem:[#allocation2 + $0x18] sm:$0xff] }
  0x15   :  { %137 = vperm.xlu0 %398, %v131_v5   ;;  %143 = vperm.xlu1 %399, %v133_v6   ;;  %v37_v22 = vld [vmem:[#allocation2 + $0x10] sm:$0xff]  ;;  %v36_v23 = vld [vmem:[#allocation2 + $0x8] sm:$0xff]  ;;  %v35_v24 = vld [vmem:[#allocation2] sm:$0xff] }
  0x16   :  { %v32_v25 = vld [vmem:[%s604_s1] sm:$0xff]  ;;  %v33_v26 = vld [vmem:[%s604_s1 + $0x8] sm:$0xff]  ;;  %v34_v27 = vld [vmem:[%s604_s1 + $0x10] sm:$0xff]  ;;  %s489_s1 = smov [#allocation5]  }
  0x17   :  { %320 = vmatpush3.xpose.msra.mxu0 %v49_v3  ;;  %375 = vmatpush3.xpose.msra.mxu1 %v49_v3  ;;  %s265_s6 = sshll.u32 %s489_s1, 4  ;;  %s266_s6 = int_to_ptr.vmem [resolvable:$true] %s265_s6 }
  0x18   :  { %321 = vmatprep.subr.mxu0 %v486_v0  ;;  %360 = vmatprep.subr.mxu1 %v486_v0  ;;  %s437_s9 = scalar_lea.vmem %s266_s6, 128  ;;  %p442_p6 = scmp.lt.s32.totalorder %s266_s6, %s266_s6 }
  0x19   :  { %140 = vperm.xlu0 %398, %v132_v7   ;;  %401 = vperm.xlu1 %399, %v400_v11   ;;  %p438_p5 = scmp.ne.s32.totalorder %s266_s6, %s437_s9  ;;  %p443_p7 = scmp.lt.s32.totalorder %s437_s9, %s437_s9 }
  0x1b   :  { %322 = vmatpush3.xpose.msra.mxu0 %v48_v4  ;;  %376 = vmatpush3.xpose.msra.mxu1 %v48_v4  ;;  %v294_v4 = vsel %vm163_vm7, 1.0, %v486_v0  ;;  %p444_p8 = por %p443_p7, %p442_p6 }
  0x1c   :  { %323 = vmatprep.subr.mxu0 %v486_v0  ;;  %361 = vmatprep.subr.mxu1 %v486_v0 }
  0x1d   :  { %178 = vperm.xlu0 %398, %v293_v12   ;;  %p445_p9 = pnand %p444_p8, %p438_p5 }
  0x1f   :  { %324 = vmatpush3.xpose.msra.mxu0 %v47_v10  ;;  %377 = vmatpush3.xpose.msra.mxu1 %v47_v10 }
  0x20   :  { %325 = vmatprep.subr.mxu0 %v486_v0  ;;  %362 = vmatprep.subr.mxu1 %v486_v0 }
  0x23   :  { %326 = vmatpush3.xpose.msra.mxu0 %v46_v13  ;;  %378 = vmatpush3.xpose.msra.mxu1 %v46_v13 }
  0x24   :  { %327 = vmatprep.subr.mxu0 %v486_v0  ;;  %363 = vmatprep.subr.mxu1 %v486_v0 }
  0x27   :  { %328 = vmatpush3.xpose.msra.mxu0 %v45_v14  ;;  %379 = vmatpush3.xpose.msra.mxu1 %v45_v14 }
  0x28   :  { %329 = vmatprep.subr.mxu0 %v486_v0  ;;  %364 = vmatprep.subr.mxu1 %v486_v0 }
  0x2b   :  { %330 = vmatpush3.xpose.msra.mxu0 %v44_v15  ;;  %380 = vmatpush3.xpose.msra.mxu1 %v44_v15 }
  0x2c   :  { %331 = vmatprep.subr.mxu0 %v486_v0  ;;  %365 = vmatprep.subr.mxu1 %v486_v0 }
  0x2f   :  { %332 = vmatpush3.xpose.msra.mxu0 %v43_v16  ;;  %381 = vmatpush3.xpose.msra.mxu1 %v43_v16 }
  0x30   :  { %333 = vmatprep.subr.mxu0 %v486_v0  ;;  %366 = vmatprep.subr.mxu1 %v486_v0 }
  0x33   :  { %334 = vmatpush3.xpose.msra.mxu0 %v42_v17  ;;  %382 = vmatpush3.xpose.msra.mxu1 %v42_v17 }
  0x34   :  { %335 = vmatprep.subr.mxu0 %v486_v0  ;;  %367 = vmatprep.subr.mxu1 %v486_v0 }
  0x37   :  { %336 = vmatpush3.xpose.msra.mxu0 %v41_v18  ;;  %383 = vmatpush3.xpose.msra.mxu1 %v41_v18 }
  0x38   :  { %337 = vmatprep.subr.mxu0 %v486_v0  ;;  %368 = vmatprep.subr.mxu1 %v486_v0 }
  0x3b   :  { %338 = vmatpush3.xpose.msra.mxu0 %v40_v19  ;;  %384 = vmatpush3.xpose.msra.mxu1 %v40_v19 }
  0x3c   :  { %339 = vmatprep.subr.mxu0 %v486_v0  ;;  %369 = vmatprep.subr.mxu1 %v486_v0 }
  0x3f   :  { %340 = vmatpush3.xpose.msra.mxu0 %v39_v20  ;;  %385 = vmatpush3.xpose.msra.mxu1 %v39_v20 }
  0x40   :  { %341 = vmatprep.subr.mxu0 %v486_v0  ;;  %370 = vmatprep.subr.mxu1 %v486_v0 }
  0x43   :  { %342 = vmatpush3.xpose.msra.mxu0 %v38_v21  ;;  %386 = vmatpush3.xpose.msra.mxu1 %v38_v21 }
  0x44   :  { %343 = vmatprep.subr.mxu0 %v486_v0  ;;  %371 = vmatprep.subr.mxu1 %v486_v0 }
  0x47   :  { %344 = vmatpush3.xpose.msra.mxu0 %v37_v22  ;;  %387 = vmatpush3.xpose.msra.mxu1 %v37_v22 }
  0x48   :  { %345 = vmatprep.subr.mxu0 %v486_v0  ;;  %372 = vmatprep.subr.mxu1 %v486_v0 }
  0x4b   :  { %346 = vmatpush3.xpose.msra.mxu0 %v36_v23  ;;  %388 = vmatpush3.xpose.msra.mxu1 %v36_v23 }
  0x4c   :  { %347 = vmatprep.subr.mxu0 %v486_v0  ;;  %373 = vmatprep.subr.mxu1 %v486_v0 }
  0x4f   :  { %348 = vmatpush3.xpose.msra.mxu0 %v35_v24  ;;  %389 = vmatpush3.xpose.msra.mxu1 %v35_v24 }
  0x52   :  { %350 = vmatmul.mubr.f32.vlgmr.msra.gmra.mxu0 %v32_v25  ;;  %353 = vmatmul.mubr.f32.vlgmr.msra.gmra.mxu1 %v33_v26 }
  0x53   :  { %355 = vmatprep.mubr.msk.f32.mxu1 %vm487_vm0, %v486_v0 }
  0x56   :  { %356 = vmatmul.mubr.f32.gmra.mxu1 %v34_v27 }
  0x90   :  { %v138_v48 = vpop.permute.xlu0 %137  ;;  %v144_v52 = vpop.permute.xlu1 %143 }
  0x91   :  { %vm145_vm4 = vcmp.eq.s32.totalorder %v138_v48, %v135_v51  ;;  %vm147_vm6 = vcmp.eq.s32.totalorder %v144_v52, %v135_v51 }
  0x92   :  { %v288_v56 = vsel %vm145_vm4, 1.0, %v486_v0  ;;  %v290_v3 = vsel %vm147_vm6, 1.0, %v486_v0 }
  0x93   :  { %v184_v6 = vsub.f32 1.0, %v288_v56  ;;  %v186_v27 = vsub.f32 1.0, %v290_v3 }
  0x94   :  { %v141_v54 = vpop.permute.xlu0 %140  ;;  %v402_v61 = vpop.permute.xlu1 %401 }
  0x95   :  { %vm146_vm5 = vcmp.eq.s32.totalorder %v141_v54, %v135_v51  ;;  %v404_v8 = vunpack.i.h.bf16 %v402_v61  ;;  %v403_v9 = vunpack.i.l.bf16 %v402_v61 }
  0x96   :  { %v289_v60 = vsel %vm146_vm5, 1.0, %v486_v0 }
  0x97   :  { %v185_v7 = vsub.f32 1.0, %v289_v60  ;;  %v182_v23 = vmul.f32 %v404_v8, %v294_v4  ;;  %v181_v24 = vmul.f32 %v403_v9, %v294_v4 }
  0x98   :  { %v179_v18 = vpop.permute.xlu0 %178 }
 0x112   :  { %v578_v28 = vpop.f32.mrf.mxu0  ;;  %v580_v29 = vpop.f32.mrf.mxu1 }
 0x113   :  { %v196_v30 = vand.u32 2147483647, %v578_v28  ;;  %v197_v31 = vand.u32 2147483647, %v580_v29  ;;  %v190_v57 = vsub.f32 0.0, %v578_v28  ;;  %v191_v59 = vsub.f32 0.0, %v580_v29 }
 0x114   :  { %v351_v32 = vpop.f32.mrf.mxu0  ;;  %v354_v33 = vpop.f32.mrf.mxu1 }
 0x115   :  { %v199_v34 = vsub.f32 0.0, %v196_v30  ;;  %v200_v35 = vsub.f32 0.0, %v197_v31  ;;  %v193_v11 = vmax.f32 %v190_v57, 0.0  ;;  %v194_v14 = vmax.f32 %v191_v59, 0.0 }
 0x116   :  { %v584_v36 = vpop.f32.mrf.mxu1  ;;  %v183_v30 = vmul.f32 %v294_v4, %v179_v18 }
 0x117   :  { %v202_v37 = vmul.f32 1.442695, %v199_v34  ;;  %v204_v38 = vmul.f32 1.442695, %v200_v35  ;;  %v198_v39 = vand.u32 2147483647, %v584_v36 }
 0x118   :  { %v357_v40 = vpop.f32.mrf.mxu1  ;;  %v192_v20 = vsub.f32 0.0, %v584_v36  ;;  %v189_v52 = vmul.f32 %v186_v27, %v183_v30 }
 0x119   :  { %405 = vpow2.f32 %v202_v37  ;;  %v201_v41 = vsub.f32 0.0, %v198_v39 }
 0x11a   :  { %407 = vpow2.f32 %v204_v38  ;;  %v195_v37 = vmax.f32 %v192_v20, 0.0 }
 0x11b   :  { %v206_v42 = vmul.f32 1.442695, %v201_v41  ;;  %v188_v41 = vmul.f32 %v185_v7, %v182_v23 }
 0x11d   :  { %409 = vpow2.f32 %v206_v42  ;;  %v187_v42 = vmul.f32 %v184_v6, %v181_v24 }
 0x126   :  { %v406_v43 = vpop.eup %405 }
 0x127   :  { %v408_v44 = vpop.eup %407  ;;  %v208_v45 = vadd.f32 1.0, %v406_v43  ;;  %v211_v53 = vmul.f32 -0.5, %v406_v43  ;;  %v214_v62 = vand.u32 2147483647, %v406_v43 }
 0x128   :  { %v217_v46 = vadd.f32 1.0, %v408_v44  ;;  %v220_v55 = vmul.f32 -0.5, %v408_v44  ;;  %v223_v2 = vand.u32 2147483647, %v408_v44 }
 0x129   :  { %411 = vlog2.f32 %v208_v45  ;;  %v212_v58 = vadd.f32 1.0, %v211_v53  ;;  %vm215_vm8 = vcmp.lt.f32.partialorder %v214_v62, 0.0004427343 }
 0x12a   :  { %413 = vlog2.f32 %v217_v46  ;;  %v410_v49 = vpop.eup %409  ;;  %v221_v63 = vadd.f32 1.0, %v220_v55  ;;  %vm224_vm9 = vcmp.lt.f32.partialorder %v223_v2, 0.0004427343 }
 0x12b   :  { %v226_v50 = vadd.f32 1.0, %v410_v49  ;;  %v229_v1 = vmul.f32 -0.5, %v410_v49  ;;  %v213_v13 = vmul.f32 %v406_v43, %v212_v58  ;;  %v232_v0 = vand.u32 2147483647, %v410_v49 }
 0x12c   :  { %v222_v16 = vmul.f32 %v408_v44, %v221_v63 }
 0x12d   :  { %415 = vlog2.f32 %v226_v50  ;;  %v230_v17 = vadd.f32 1.0, %v229_v1  ;;  %vm233_vm10 = vcmp.lt.f32.partialorder %v232_v0, 0.0004427343 }
 0x12f   :  { %v231_v33 = vmul.f32 %v410_v49, %v230_v17 }
 0x136   :  { %v412_v5 = vpop.eup %411 }
 0x137   :  { %v414_v10 = vpop.eup %413  ;;  %v210_v12 = vmul.f32 0.6931472, %v412_v5 }
 0x138   :  { %v219_v15 = vmul.f32 0.6931472, %v414_v10 }
 0x139   :  { %v216_v19 = vsel %vm215_vm8, %v213_v13, %v210_v12 }
 0x13a   :  { %v235_v21 = vadd.f32 %v216_v19, %v193_v11  ;;  %v225_v22 = vsel %vm224_vm9, %v222_v16, %v219_v15  ;;  %v416_v25 = vpop.eup %415 }
 0x13b   :  { %v236_v26 = vadd.f32 %v225_v22, %v194_v14  ;;  %v228_v32 = vmul.f32 0.6931472, %v416_v25 }
 0x13c   :  { %v244_v31 = vadd.f32 %v235_v21, %v578_v28  ;;  %v238_v34 = vsub.f32 0.6931472, %v235_v21 }
 0x13d   :  { %v245_v35 = vadd.f32 %v236_v26, %v580_v29  ;;  %v239_v38 = vsub.f32 0.6931472, %v236_v26  ;;  %v234_v40 = vsel %vm233_vm10, %v231_v33, %v228_v32 }
 0x13e   :  { %v295_v39 = vadd.f32 -0.6931472, %v244_v31  ;;  %v237_v44 = vadd.f32 %v234_v40, %v195_v37  ;;  %v241_v45 = vmul.f32 %v288_v56, %v238_v34 }
 0x13f   :  { %v296_v43 = vadd.f32 -0.6931472, %v245_v35  ;;  %v242_v46 = vmul.f32 %v289_v60, %v239_v38 }
 0x140   :  { %v246_v47 = vadd.f32 %v237_v44, %v584_v36  ;;  %v240_v48 = vsub.f32 0.6931472, %v237_v44  ;;  %v250_v28 = vmul.f32 %v295_v39, %v187_v42 }
 0x141   :  { %v251_v50 = vmul.f32 %v296_v43, %v188_v41  ;;  %v253_v51 = vadd.f32 %v242_v46, %v241_v45 }
 0x142   :  { %v297_v49 = vadd.f32 -0.6931472, %v246_v47  ;;  %v243_v29 = vmul.f32 %v290_v3, %v240_v48 }
 0x143   :  { %v256_v55 = vadd.f32 %v251_v50, %v250_v28 }
 0x144   :  { %v252_v53 = vmul.f32 %v297_v49, %v189_v52  ;;  %v254_v54 = vadd.f32 %v253_v51, %v243_v29 }
 0x146   :  { %255 = vst [vmem:[#allocation5] sm:$0xff] %v254_v54  ;;  %v257_v56 = vadd.f32 %v256_v55, %v252_v53 }
 0x147   :  { %448 = shalt.err (!%p445_p9)
}
 0x148   :  { %268 = dma.vmem_to_hbm [thread:$0]  %s266_s6, 128, %s606_s3, [#allocation4]   ;;  %258 = vst [vmem:[#allocation6] sm:$0xff] %v257_v56 }
 0x149   :  { %s457_s12 = scalar_lea.vmem %s276_s8, 128  ;;  %p462_p11 = scmp.lt.s32.totalorder %s276_s8, %s276_s8 }
 0x14a   :  { %p458_p10 = scmp.ne.s32.totalorder %s276_s8, %s457_s12  ;;  %p463_p12 = scmp.lt.s32.totalorder %s457_s12, %s457_s12 }
 0x14c   :  { %p464_p13 = por %p463_p12, %p462_p11 }
 0x14e   :  { %p465_p0 = pnand %p464_p13, %p458_p10 }
 0x150   :  { %468 = shalt.err (!%p465_p0)
}
 0x151   :  { %278 = dma.vmem_to_hbm [thread:$0]  %s276_s8, 128, %s607_s4, [#allocation7]  }
 0x152   :  { %479 = dma.done.wait [#allocation4], 128  }
 0x153   :  { %480 = vsyncadd [#allocation4], 4294967168 }
 0x154   :  { %481 = dma.done.wait [#allocation7], 128  }
 0x155   :  { %482 = vsyncadd [#allocation7], 4294967168 }
 0x156   :  { %285 = vsyncpa [#allocation3], 1 }
 0x157   :  { %286 = vsyncpa [#allocation4], 1 }
 0x158   :  { %287 = vsyncpa [#allocation7], 1 }

</bundles_post_ra>
